<compile_context>
chip_gen: v7x
topology: tpu7x:2x2x1
jax: 0.10.0
libtpu: 0.0.40
codegen_flags: <defaults>
</compile_context>

<pallas_src>
import jax
import jax.numpy as jnp
from jax.experimental import pallas as pl
from jax.experimental.pallas import tpu as pltpu


def _copy_kernel(x_ref, o_ref):
    # Identity copy of the current (tb, C) block.
    o_ref[...] = x_ref[...]


def _resolve_target_shape(in_shape, target_shape):
    """Resolve a torch-style target shape (supports a single -1 dim)."""
    n = 1
    for d in in_shape[1:]:
        n *= d
    tgt = list(target_shape)
    neg = [i for i, d in enumerate(tgt) if d == -1]
    assert len(neg) <= 1, "at most one -1 dim allowed in View shape"
    known = 1
    for d in tgt:
        if d != -1:
            known *= d
    if neg:
        assert known != 0 and n % known == 0, (
            f"cannot view {in_shape} as (B, {tuple(target_shape)})")
        tgt[neg[0]] = n // known
    else:
        assert known == n, (
            f"cannot view {in_shape} as (B, {tuple(target_shape)})")
    return tuple(tgt), n


def _round_up(x, m):
    return ((x + m - 1) // m) * m


def _vmem_budget():
    """Generation-aware (block_budget_bytes, vmem_limit_bytes)."""
    try:
        phys = int(pltpu.get_tpu_info().vmem_capacity_bytes)
    except Exception:
        phys = 64 * 1024 * 1024  # conservative (v7x-sized) fallback
    if phys >= 128 * 1024 * 1024:      # v5e / v6e: 128 MiB physical VMEM
        return 8 * 1024 * 1024, 48 * 1024 * 1024
    elif phys >= 64 * 1024 * 1024:     # v7x: 64 MiB per TensorCore
        return 8 * 1024 * 1024, 44 * 1024 * 1024
    else:                              # unknown / small part
        return 4 * 1024 * 1024, 32 * 1024 * 1024


def pallas_view(x, target_shape):
    """Reproduce View(target_shape).forward(x): x.view(B, *target_shape)."""
    b = x.shape[0]
    tgt, n = _resolve_target_shape(x.shape, target_shape)
    out_shape = (b, *tgt)
    total = b * n
    itemsize = jnp.dtype(x.dtype).itemsize

    # Degenerate / non-128-divisible sizes: a view is metadata-only anyway.
    if total == 0 or total % 128 != 0:
        return x.reshape(out_shape)

    # Lane-dense 2-D slab (R, C): C the largest of 1024/512/256/128 dividing
    # the element count, so every store is an unmasked full-lane vst.
    for cand in (1024, 512, 256, 128):
        if total % cand == 0:
            C = cand
            break
    R = total // C

    # Dtype-aware sublane alignment: packed dtypes travel 8*(4/itemsize) rows
    # per vreg tile (8 for f32, 16 for bf16, 32 for int8/fp8).
    align = max(8, 8 * (4 // max(1, itemsize)))

    block_budget_bytes, vmem_limit_bytes = _vmem_budget()

    if R <= align:
        tb = R  # full-extent block along rows (always a legal block dim)
    else:
        tb_cap = max(align,
                     (block_budget_bytes // (C * itemsize) // align) * align)
        tb = min(tb_cap, _round_up(R, align))
        # Ensure >=2 grid steps when the data allows it: lets v7x's two
        # TensorCores split the copy and overlaps in/out DMAs of neighbors.
        if pl.cdiv(R, tb) < 2 and R >= 2 * align:
            tb = _round_up(pl.cdiv(R, 2), align)

    grid = (pl.cdiv(R, tb),)  # cdiv grid: remainder block is padded/masked

    x_slab = x.reshape(R, C)

    out_slab = pl.pallas_call(
        _copy_kernel,
        out_shape=jax.ShapeDtypeStruct((R, C), x.dtype),
        grid_spec=pltpu.PrefetchScalarGridSpec(
            num_scalar_prefetch=0,
            grid=grid,
            in_specs=[pl.BlockSpec((tb, C), lambda i: (i, 0))],
            out_specs=pl.BlockSpec((tb, C), lambda i: (i, 0)),
        ),
        compiler_params=pltpu.CompilerParams(
            dimension_semantics=("parallel",),
            vmem_limit_bytes=vmem_limit_bytes,
        ),
        cost_estimate=pl.CostEstimate(
            flops=0,
            transcendentals=0,
            bytes_accessed=2 * total * itemsize,
        ),
    )(x_slab)

    # Zero-cost metadata reshape to the requested view.
    return out_slab.reshape(out_shape)


if __name__ == "__main__":
    key = jax.random.PRNGKey(0)
    # Small NCHW input: batch=2, channels=4, spatial=16x16.
    x = jax.random.normal(key, (2, 4, 16, 16), dtype=jnp.float32)

    # Common VAE-style flatten with an inferred dim.
    out_flat = pallas_view(x, (-1,))
    out_flat = jax.block_until_ready(out_flat)
    ref_flat = x.reshape(x.shape[0], -1)
    assert out_flat.shape == ref_flat.shape, (out_flat.shape, ref_flat.shape)
    assert jnp.array_equal(out_flat, ref_flat), "mismatch vs reference reshape"

    # Explicit multi-dim target shape.
    out_md = pallas_view(x, (16, 64))
    out_md = jax.block_until_ready(out_md)
    ref_md = x.reshape(x.shape[0], 16, 64)
    assert out_md.shape == ref_md.shape, (out_md.shape, ref_md.shape)
    assert jnp.array_equal(out_md, ref_md), "mismatch vs reference reshape"

    # Larger bf16 input exercising dtype-aware alignment + multi-step grid.
    xb = jax.random.normal(key, (8, 4, 64, 64), dtype=jnp.bfloat16)
    out_b = jax.block_until_ready(pallas_view(xb, (4, -1)))
    ref_b = xb.reshape(8, 4, -1)
    assert out_b.shape == ref_b.shape and jnp.array_equal(out_b, ref_b)

    print("KERNEL_OK")
</pallas_src>

<mosaic_0001>
module attributes {stable_mosaic.version = 11 : i64} {
  func.func @_copy_kernel(%arg0: i32, %arg1: memref<2x1024xf32, #tpu.memory_space<vmem>>, %arg2: memref<2x1024xf32, #tpu.memory_space<vmem>>) attributes {dimension_semantics = [#tpu.dimension_semantics<parallel>], iteration_bounds = array<i64: 1>, scalar_prefetch = 0 : i64, scratch_operands = 0 : i64, tpu.core_type = #tpu.core_type<tc>, window_params = [{transform_indices = @transform_0, window_bounds = array<i64: 2, 1024>}, {transform_indices = @transform_1, window_bounds = array<i64: 2, 1024>}]} {
    %c0 = arith.constant 0 : index
    %c0_0 = arith.constant 0 : index
    %0 = vector.load %arg1[%c0, %c0_0] : memref<2x1024xf32, #tpu.memory_space<vmem>>, vector<2x1024xf32>
    %c0_1 = arith.constant 0 : index
    %c0_2 = arith.constant 0 : index
    %1 = vector.load %arg2[%c0_1, %c0_2] : memref<2x1024xf32, #tpu.memory_space<vmem>>, vector<2x1024xf32>
    tpu.vector_store %arg2[%c0_1, %c0_2], %0 {strides = array<i32>} : memref<2x1024xf32, #tpu.memory_space<vmem>>, vector<2x1024xf32>,
    return
  }
  func.func @transform_0(%arg0: i32) -> (i32, i32) {
    %c0_i32 = arith.constant 0 : i32
    %c0_i32_0 = arith.constant 0 : i32
    return %arg0, %c0_i32 : i32, i32
  }
  func.func @transform_1(%arg0: i32) -> (i32, i32) {
    %c0_i32 = arith.constant 0 : i32
    %c0_i32_0 = arith.constant 0 : i32
    return %arg0, %c0_i32 : i32, i32
  }
}

</mosaic_0001>

<bundles_post_ra>
// kernel: tpu_custom_call.1
= control target key start
LH: loop header
LB: loop body
LE: loop exit
PB: predicated region body
PF: predicated region fallthrough
CT: control target
= control target key end

     0   :  { %6 = vsyncpa [#allocation3], 0  ;;  %s126_s0 = inlined_call_operand.hbm [shape: f32[2,1024], index: 0, kind: input, shape index: {}]   ;;  %s127_s1 = inlined_call_operand.hbm [shape: f32[2,1024], index: 1, kind: output, shape index: {}]  }
   0x1   :  { %7 = vsyncpa [#allocation4], 0  ;;  %s90_s6 = smov [#allocation2]   ;;  %s42_s10 = scalar_lea.hbm %s126_s0, 256 }
   0x2   :  { %s14_s7 = sshll.u32 %s90_s6, 4  ;;  %p43_p0 = scmp.ne.s32.totalorder %s126_s0, %s42_s10  ;;  %s15_s7 = int_to_ptr.vmem [resolvable:$true] %s14_s7 }
   0x3   :  { %p46_p1 = scmp.lt.u32.totalorder %s42_s10, %s126_s0 }
   0x5   :  { %p48_p2 = pnand %p46_p1, %p43_p0 }
   0x7   :  { %51 = shalt.err (!%p48_p2)
}
   0x8   :  { %s52_s15 = scalar_lea.vmem %s15_s7, 256  ;;  %p57_p4 = scmp.lt.s32.totalorder %s15_s7, %s15_s7 }
   0x9   :  { %p53_p3 = scmp.ne.s32.totalorder %s15_s7, %s52_s15  ;;  %p58_p5 = scmp.lt.s32.totalorder %s52_s15, %s52_s15 }
   0xb   :  { %p59_p6 = por %p58_p5, %p57_p4 }
   0xd   :  { %p60_p7 = pnand %p59_p6, %p53_p3 }
   0xf   :  { %63 = shalt.err (!%p60_p7)
}
  0x10   :  { %17 = dma.hbm_to_vmem [thread:$0]  %s126_s0, 256, %s15_s7, [#allocation3]  }
  0x11   :  { %86 = dma.done.wait [#allocation3], 256  }
  0x12   :  { %87 = vsyncadd [#allocation3], 4294967040  ;;  %s91_s18 = smov [#allocation5]   ;;  %v21_v0 = vld [vmem:[#allocation2] sm:$0xff]  ;;  %v22_v1 = vld [vmem:[#allocation2 + $0x8] sm:$0xff] }
  0x13   :  { %s31_s19 = sshll.u32 %s91_s18, 4  ;;  %23 = vst [vmem:[#allocation5] sm:$0xff] %v21_v0  ;;  %24 = vst [vmem:[#allocation5 + $0x8] sm:$0xff] %v22_v1  ;;  %s32_s19 = int_to_ptr.vmem [resolvable:$true] %s31_s19 }
  0x14   :  { %s64_s20 = scalar_lea.vmem %s32_s19, 256  ;;  %p69_p9 = scmp.lt.s32.totalorder %s32_s19, %s32_s19 }
  0x15   :  { %p65_p8 = scmp.ne.s32.totalorder %s32_s19, %s64_s20  ;;  %p70_p10 = scmp.lt.s32.totalorder %s64_s20, %s64_s20 }
  0x17   :  { %p71_p11 = por %p70_p10, %p69_p9 }
  0x19   :  { %p72_p12 = pnand %p71_p11, %p65_p8 }
  0x1b   :  { %75 = shalt.err (!%p72_p12)
}
  0x1c   :  { %s76_s0 = scalar_lea.hbm %s127_s1, 256 }
  0x1d   :  { %p77_p13 = scmp.ne.s32.totalorder %s127_s1, %s76_s0  ;;  %p80_p0 = scmp.lt.u32.totalorder %s76_s0, %s127_s1 }
  0x1f   :  { %p82_p1 = pnand %p80_p0, %p77_p13 }
  0x21   :  { %85 = shalt.err (!%p82_p1)
}
  0x22   :  { %34 = dma.vmem_to_hbm [thread:$0]  %s32_s19, 256, %s127_s1, [#allocation4]  }
  0x23   :  { %88 = dma.done.wait [#allocation4], 256  }
  0x24   :  { %89 = vsyncadd [#allocation4], 4294967040 }
  0x25   :  { %38 = vsyncpa [#allocation3], 1 }
  0x26   :  { %39 = vsyncpa [#allocation4], 1 }

</bundles_post_ra>
